<compile_context>
chip_gen: v7x
topology: tpu7x:2x2x1
jax: 0.10.0
libtpu: 0.0.40
codegen_flags: <defaults>
</compile_context>

<pallas_src>
import numpy as np
import jax
import jax.numpy as jnp
from jax.experimental import pallas as pl
from jax.experimental.pallas import tpu as pltpu

BN_EPS = 1e-3


def _tap_masks(H, W):
    """(9, 1, H*W) f32 validity mask per depthwise tap (host constant).

    Lane p corresponds to (h, w) = (p // W, p % W); tap k = (kh, kw) reads
    neighbor (h + kh - 1, w + kw - 1).  Where that neighbor is outside the
    image the mask is 0, which also kills every lane that a full-axis lane
    roll wraps around.
    """
    p = np.arange(H * W)
    h, w = p // W, p % W
    m = np.zeros((9, 1, H * W), np.float32)
    for k in range(9):
        dh, dwd = k // 3 - 1, k % 3 - 1
        valid = (h + dh >= 0) & (h + dh < H) & (w + dwd >= 0) & (w + dwd < W)
        m[k, 0] = valid.astype(np.float32)
    return jnp.asarray(m)


def _make_ddb_b_kernel(Cin, G, W, HW):
    """Kernel factory; Cin, G, W, HW are static."""
    # Row layout of the packed small-parameter input (shape (13+Cin, G, 1)):
    IDX_G1, IDX_B1, IDX_G2, IDX_B2 = 0, 1, 2, 3
    IDX_DW = 4          # rows 4..12  : depthwise taps 0..8
    IDX_W1 = 13         # rows 13..   : 1x1-conv weight columns per in-channel

    def kernel(x_ref, p_ref, mask_ref, out_ref):
        # x_ref   : (N, Cin, HW)        input (free reshape of NCHW)
        # p_ref   : (13+Cin, G, 1)      packed small params (see layout above)
        # mask_ref: (9, 1, HW)          per-tap boundary validity masks
        # out_ref : (N, Cin+G, HW)      [feat, inter] fused concat
        N = x_ref.shape[0]
        inv_cnt = 1.0 / float(N * HW)

        x = x_ref[...]                                   # (N, Cin, HW)

        # ---- fused concat, pass-through half: store first so x dies early ----
        out_ref[:, 0:Cin, :] = x

        # ---- 1x1 (pointwise) conv: Cin lane-dense VPU FMAs (MXU not worth it) ----
        t = x[:, 0:1, :] * p_ref[IDX_W1:IDX_W1 + 1]      # (N, G, HW)
        for c in range(1, Cin):
            t = t + x[:, c:c + 1, :] * p_ref[IDX_W1 + c:IDX_W1 + c + 1]

        # ---- training-mode BN batch stats: fused sum / sumsq, one sweep ----
        # (E[x^2]-E[x]^2 form; fine at these magnitudes with eps=1e-3.)
        def batch_stats(y):
            s = jnp.sum(y, axis=-1, keepdims=True)       # (N, G, 1) lane reduce
            q = jnp.sum(y * y, axis=-1, keepdims=True)
            st, qt = s[0:1], q[0:1]
            for i in range(1, N):                        # N is tiny & static
                st = st + s[i:i + 1]
                qt = qt + q[i:i + 1]
            m = st * inv_cnt
            v = qt * inv_cnt - m * m                     # biased variance
            return m, v                                  # (1, G, 1) each

        # ---- BN #1 ----
        m1, v1 = batch_stats(t)
        sc1 = jax.lax.rsqrt(v1 + BN_EPS) * p_ref[IDX_G1:IDX_G1 + 1]
        t = t * sc1 + (p_ref[IDX_B1:IDX_B1 + 1] - m1 * sc1)

        # ---- depthwise 3x3, stride 1, padding 1: 9 XLU lane rolls ----
        # Tap k reads flat neighbor p + d; roll by (-d) mod HW puts that
        # neighbor at lane p, and every wrapped lane is zeroed by mask[k].
        acc = None
        for k in range(9):                               # static unroll, 9 taps
            d = (k // 3 - 1) * W + (k % 3 - 1)
            shift = (-d) % HW                            # static, non-negative
            shifted = pltpu.roll(t, shift, axis=2) if shift else t
            term = (shifted
                    * p_ref[IDX_DW + k:IDX_DW + k + 1]   # (1, G, 1) tap weight
                    * mask_ref[k:k + 1])                 # (1, 1, HW) boundary mask
            acc = term if acc is None else acc + term    # (N, G, HW)

        # ---- BN #2 + ReLU ----
        m2, v2 = batch_stats(acc)
        sc2 = jax.lax.rsqrt(v2 + BN_EPS) * p_ref[IDX_G2:IDX_G2 + 1]
        a = acc * sc2 + (p_ref[IDX_B2:IDX_B2 + 1] - m2 * sc2)
        a = jnp.maximum(a, 0.0)

        # ---- fused concat, new-channel half ----
        out_ref[:, Cin:, :] = a

    return kernel


def ddb_b_forward(feat_nchw, params):
    """feat_nchw: (N, Cin, H, W) f32  ->  (N, Cin + G, H, W) f32"""
    w1, dw = params["w1"], params["dw"]                  # (Cin, G), (9, G)
    g1, b1, g2, b2 = params["g1"], params["b1"], params["g2"], params["b2"]
    N, Cin, H, W = feat_nchw.shape
    G = w1.shape[1]
    HW = H * W

    # Free reshape of NCHW; no transposes anywhere in the wrapper.
    x = feat_nchw.reshape(N, Cin, HW)

    # One packed small-parameter input: [g1, b1, g2, b2, dw taps, w1 columns].
    packed = jnp.concatenate(
        [g1[None, :], b1[None, :], g2[None, :], b2[None, :], dw, w1], axis=0
    ).reshape(13 + Cin, G, 1).astype(jnp.float32)

    mask = _tap_masks(H, W)                              # (9, 1, HW) constant

    out = pl.pallas_call(
        _make_ddb_b_kernel(Cin, G, W, HW),
        out_shape=jax.ShapeDtypeStruct((N, Cin + G, HW), jnp.float32),
        in_specs=[pl.BlockSpec(memory_space=pltpu.MemorySpace.VMEM)] * 3,
        out_specs=pl.BlockSpec(memory_space=pltpu.MemorySpace.VMEM),
    )(x, packed, mask)

    return out.reshape(N, Cin + G, H, W)


def init_params(key, n, g):
    """Deterministic xavier_uniform init matching the torch shapes/fans."""
    k1, k2 = jax.random.split(key)
    bound1 = float(np.sqrt(6.0 / (n + g)))           # Conv2d(n, g, 1x1)
    bound2 = float(np.sqrt(6.0 / (1 * 9 + g * 9)))   # Conv2d(g, g, 3x3, groups=g)
    w1 = jax.random.uniform(k1, (n, g), jnp.float32, -bound1, bound1)
    dw = jax.random.uniform(k2, (9, g), jnp.float32, -bound2, bound2)
    return dict(
        w1=w1, dw=dw,
        g1=jnp.ones((g,), jnp.float32), b1=jnp.zeros((g,), jnp.float32),
        g2=jnp.ones((g,), jnp.float32), b2=jnp.zeros((g,), jnp.float32),
    )


def reference_forward(feat, params):
    """Pure-JAX reference (NCHW) mirroring the PyTorch module in train mode."""
    w1, dw = params["w1"], params["dw"]
    g1, b1, g2, b2 = params["g1"], params["b1"], params["g2"], params["b2"]
    N, Cin, H, W = feat.shape
    G = w1.shape[1]
    t = jnp.einsum("nchw,cg->nghw", feat, w1)
    m = t.mean(axis=(0, 2, 3), keepdims=True)
    v = ((t - m) ** 2).mean(axis=(0, 2, 3), keepdims=True)
    t = (t - m) / jnp.sqrt(v + BN_EPS) * g1.reshape(1, G, 1, 1) + b1.reshape(1, G, 1, 1)
    tp = jnp.pad(t, ((0, 0), (0, 0), (1, 1), (1, 1)))
    acc = jnp.zeros_like(t)
    for kh in range(3):
        for kw in range(3):
            acc = acc + tp[:, :, kh:kh + H, kw:kw + W] * dw[kh * 3 + kw].reshape(1, G, 1, 1)
    m2 = acc.mean(axis=(0, 2, 3), keepdims=True)
    v2 = ((acc - m2) ** 2).mean(axis=(0, 2, 3), keepdims=True)
    a = (acc - m2) / jnp.sqrt(v2 + BN_EPS) * g2.reshape(1, G, 1, 1) + b2.reshape(1, G, 1, 1)
    a = jnp.maximum(a, 0.0)
    return jnp.concatenate([feat, a], axis=1)


if __name__ == "__main__":
    key = jax.random.PRNGKey(0)
    kp, kx = jax.random.split(key)

    n, g = 4, 8          # DDB_B(n=4, g=8)
    N, H, W = 2, 16, 16

    params = init_params(kp, n, g)
    feat = jax.random.normal(kx, (N, n, H, W), jnp.float32)

    out = jax.jit(lambda x: ddb_b_forward(x, params))(feat)
    out = jax.block_until_ready(out)

    assert out.shape == (N, n + g, H, W), out.shape
    ref = reference_forward(feat, params)
    np.testing.assert_allclose(np.asarray(out), np.asarray(ref), rtol=1e-4, atol=1e-4)

    print("KERNEL_OK")
</pallas_src>

<mosaic_0001>
module attributes {stable_mosaic.version = 11 : i64} {
  func.func @kernel(%arg0: memref<2x4x256xf32, #tpu.memory_space<vmem>>, %arg1: memref<17x8x1xf32, #tpu.memory_space<vmem>>, %arg2: memref<9x1x256xf32, #tpu.memory_space<vmem>>, %arg3: memref<2x12x256xf32, #tpu.memory_space<vmem>>) attributes {dimension_semantics = [], scalar_prefetch = 0 : i64, scratch_operands = 0 : i64, tpu.core_type = #tpu.core_type<tc>} {
    %c0 = arith.constant 0 : index
    %c0_0 = arith.constant 0 : index
    %c0_1 = arith.constant 0 : index
    %0 = vector.load %arg0[%c0, %c0_0, %c0_1] : memref<2x4x256xf32, #tpu.memory_space<vmem>>, vector<2x4x256xf32>
    %c0_2 = arith.constant 0 : index
    %c0_3 = arith.constant 0 : index
    %c0_4 = arith.constant 0 : index
    %1 = vector.load %arg3[%c0_2, %c0_3, %c0_4] : memref<2x12x256xf32, #tpu.memory_space<vmem>>, vector<2x4x256xf32>
    tpu.vector_store %arg3[%c0_2, %c0_3, %c0_4], %0 {strides = array<i32>} : memref<2x12x256xf32, #tpu.memory_space<vmem>>, vector<2x4x256xf32>,
    %2 = vector.extract_strided_slice %0 {offsets = [0, 0, 0], sizes = [2, 1, 256], strides = [1, 1, 1]} : vector<2x4x256xf32> to vector<2x1x256xf32>
    %c13 = arith.constant 13 : index
    %c0_5 = arith.constant 0 : index
    %c0_6 = arith.constant 0 : index
    %3 = vector.load %arg1[%c13, %c0_5, %c0_6] : memref<17x8x1xf32, #tpu.memory_space<vmem>>, vector<1x8x1xf32>
    %4 = vector.broadcast %2 : vector<2x1x256xf32> to vector<2x8x256xf32>
    %5 = vector.broadcast %3 : vector<1x8x1xf32> to vector<2x8x256xf32>
    %6 = arith.mulf %4, %5 : vector<2x8x256xf32>
    %7 = vector.extract_strided_slice %0 {offsets = [0, 1, 0], sizes = [2, 1, 256], strides = [1, 1, 1]} : vector<2x4x256xf32> to vector<2x1x256xf32>
    %c14 = arith.constant 14 : index
    %c0_7 = arith.constant 0 : index
    %c0_8 = arith.constant 0 : index
    %8 = vector.load %arg1[%c14, %c0_7, %c0_8] : memref<17x8x1xf32, #tpu.memory_space<vmem>>, vector<1x8x1xf32>
    %9 = vector.broadcast %7 : vector<2x1x256xf32> to vector<2x8x256xf32>
    %10 = vector.broadcast %8 : vector<1x8x1xf32> to vector<2x8x256xf32>
    %11 = arith.mulf %9, %10 : vector<2x8x256xf32>
    %12 = arith.addf %6, %11 : vector<2x8x256xf32>
    %13 = vector.extract_strided_slice %0 {offsets = [0, 2, 0], sizes = [2, 1, 256], strides = [1, 1, 1]} : vector<2x4x256xf32> to vector<2x1x256xf32>
    %c15 = arith.constant 15 : index
    %c0_9 = arith.constant 0 : index
    %c0_10 = arith.constant 0 : index
    %14 = vector.load %arg1[%c15, %c0_9, %c0_10] : memref<17x8x1xf32, #tpu.memory_space<vmem>>, vector<1x8x1xf32>
    %15 = vector.broadcast %13 : vector<2x1x256xf32> to vector<2x8x256xf32>
    %16 = vector.broadcast %14 : vector<1x8x1xf32> to vector<2x8x256xf32>
    %17 = arith.mulf %15, %16 : vector<2x8x256xf32>
    %18 = arith.addf %12, %17 : vector<2x8x256xf32>
    %19 = vector.extract_strided_slice %0 {offsets = [0, 3, 0], sizes = [2, 1, 256], strides = [1, 1, 1]} : vector<2x4x256xf32> to vector<2x1x256xf32>
    %c16 = arith.constant 16 : index
    %c0_11 = arith.constant 0 : index
    %c0_12 = arith.constant 0 : index
    %20 = vector.load %arg1[%c16, %c0_11, %c0_12] : memref<17x8x1xf32, #tpu.memory_space<vmem>>, vector<1x8x1xf32>
    %21 = vector.broadcast %19 : vector<2x1x256xf32> to vector<2x8x256xf32>
    %22 = vector.broadcast %20 : vector<1x8x1xf32> to vector<2x8x256xf32>
    %23 = arith.mulf %21, %22 : vector<2x8x256xf32>
    %24 = arith.addf %18, %23 : vector<2x8x256xf32>
    %cst = arith.constant dense<0.000000e+00> : vector<2x8xf32>
    %25 = vector.multi_reduction <add>, %24, %cst [2] : vector<2x8x256xf32> to vector<2x8xf32>
    %26 = vector.shape_cast %25 : vector<2x8xf32> to vector<2x8x1xf32>
    %27 = arith.mulf %24, %24 : vector<2x8x256xf32>
    %cst_13 = arith.constant dense<0.000000e+00> : vector<2x8xf32>
    %28 = vector.multi_reduction <add>, %27, %cst_13 [2] : vector<2x8x256xf32> to vector<2x8xf32>
    %29 = vector.shape_cast %28 : vector<2x8xf32> to vector<2x8x1xf32>
    %30 = vector.extract_strided_slice %26 {offsets = [0, 0, 0], sizes = [1, 8, 1], strides = [1, 1, 1]} : vector<2x8x1xf32> to vector<1x8x1xf32>
    %31 = vector.extract_strided_slice %29 {offsets = [0, 0, 0], sizes = [1, 8, 1], strides = [1, 1, 1]} : vector<2x8x1xf32> to vector<1x8x1xf32>
    %32 = vector.extract_strided_slice %26 {offsets = [1, 0, 0], sizes = [1, 8, 1], strides = [1, 1, 1]} : vector<2x8x1xf32> to vector<1x8x1xf32>
    %33 = arith.addf %30, %32 : vector<1x8x1xf32>
    %34 = vector.extract_strided_slice %29 {offsets = [1, 0, 0], sizes = [1, 8, 1], strides = [1, 1, 1]} : vector<2x8x1xf32> to vector<1x8x1xf32>
    %35 = arith.addf %31, %34 : vector<1x8x1xf32>
    %cst_14 = arith.constant 0.001953125 : f32
    %36 = vector.broadcast %cst_14 : f32 to vector<1x8x1xf32>
    %37 = arith.mulf %33, %36 : vector<1x8x1xf32>
    %cst_15 = arith.constant 0.001953125 : f32
    %38 = vector.broadcast %cst_15 : f32 to vector<1x8x1xf32>
    %39 = arith.mulf %35, %38 : vector<1x8x1xf32>
    %40 = arith.mulf %37, %37 : vector<1x8x1xf32>
    %41 = arith.subf %39, %40 : vector<1x8x1xf32>
    %cst_16 = arith.constant 1.000000e-03 : f32
    %42 = vector.broadcast %cst_16 : f32 to vector<1x8x1xf32>
    %43 = arith.addf %41, %42 : vector<1x8x1xf32>
    %44 = math.rsqrt %43 : vector<1x8x1xf32>
    %c0_17 = arith.constant 0 : index
    %c0_18 = arith.constant 0 : index
    %c0_19 = arith.constant 0 : index
    %45 = vector.load %arg1[%c0_17, %c0_18, %c0_19] : memref<17x8x1xf32, #tpu.memory_space<vmem>>, vector<1x8x1xf32>
    %46 = arith.mulf %44, %45 : vector<1x8x1xf32>
    %47 = vector.broadcast %46 : vector<1x8x1xf32> to vector<2x8x256xf32>
    %48 = arith.mulf %24, %47 : vector<2x8x256xf32>
    %c1 = arith.constant 1 : index
    %c0_20 = arith.constant 0 : index
    %c0_21 = arith.constant 0 : index
    %49 = vector.load %arg1[%c1, %c0_20, %c0_21] : memref<17x8x1xf32, #tpu.memory_space<vmem>>, vector<1x8x1xf32>
    %50 = arith.mulf %37, %46 : vector<1x8x1xf32>
    %51 = arith.subf %49, %50 : vector<1x8x1xf32>
    %52 = vector.broadcast %51 : vector<1x8x1xf32> to vector<2x8x256xf32>
    %53 = arith.addf %48, %52 : vector<2x8x256xf32>
    %c17_i32 = arith.constant 17 : i32
    %54 = tpu.dynamic_rotate %53 by %c17_i32 dim 2 : vector<2x8x256xf32>, i32 -> vector<2x8x256xf32>
    %c4 = arith.constant 4 : index
    %c0_22 = arith.constant 0 : index
    %c0_23 = arith.constant 0 : index
    %55 = vector.load %arg1[%c4, %c0_22, %c0_23] : memref<17x8x1xf32, #tpu.memory_space<vmem>>, vector<1x8x1xf32>
    %56 = vector.broadcast %55 : vector<1x8x1xf32> to vector<2x8x256xf32>
    %57 = arith.mulf %54, %56 : vector<2x8x256xf32>
    %c0_24 = arith.constant 0 : index
    %c0_25 = arith.constant 0 : index
    %c0_26 = arith.constant 0 : index
    %58 = vector.load %arg2[%c0_24, %c0_25, %c0_26] : memref<9x1x256xf32, #tpu.memory_space<vmem>>, vector<1x1x256xf32>
    %59 = vector.broadcast %58 : vector<1x1x256xf32> to vector<2x8x256xf32>
    %60 = arith.mulf %57, %59 : vector<2x8x256xf32>
    %c16_i32 = arith.constant 16 : i32
    %61 = tpu.dynamic_rotate %53 by %c16_i32 dim 2 : vector<2x8x256xf32>, i32 -> vector<2x8x256xf32>
    %c5 = arith.constant 5 : index
    %c0_27 = arith.constant 0 : index
    %c0_28 = arith.constant 0 : index
    %62 = vector.load %arg1[%c5, %c0_27, %c0_28] : memref<17x8x1xf32, #tpu.memory_space<vmem>>, vector<1x8x1xf32>
    %63 = vector.broadcast %62 : vector<1x8x1xf32> to vector<2x8x256xf32>
    %64 = arith.mulf %61, %63 : vector<2x8x256xf32>
    %c1_29 = arith.constant 1 : index
    %c0_30 = arith.constant 0 : index
    %c0_31 = arith.constant 0 : index
    %65 = vector.load %arg2[%c1_29, %c0_30, %c0_31] : memref<9x1x256xf32, #tpu.memory_space<vmem>>, vector<1x1x256xf32>
    %66 = vector.broadcast %65 : vector<1x1x256xf32> to vector<2x8x256xf32>
    %67 = arith.mulf %64, %66 : vector<2x8x256xf32>
    %68 = arith.addf %60, %67 : vector<2x8x256xf32>
    %c15_i32 = arith.constant 15 : i32
    %69 = tpu.dynamic_rotate %53 by %c15_i32 dim 2 : vector<2x8x256xf32>, i32 -> vector<2x8x256xf32>
    %c6 = arith.constant 6 : index
    %c0_32 = arith.constant 0 : index
    %c0_33 = arith.constant 0 : index
    %70 = vector.load %arg1[%c6, %c0_32, %c0_33] : memref<17x8x1xf32, #tpu.memory_space<vmem>>, vector<1x8x1xf32>
    %71 = vector.broadcast %70 : vector<1x8x1xf32> to vector<2x8x256xf32>
    %72 = arith.mulf %69, %71 : vector<2x8x256xf32>
    %c2 = arith.constant 2 : index
    %c0_34 = arith.constant 0 : index
    %c0_35 = arith.constant 0 : index
    %73 = vector.load %arg2[%c2, %c0_34, %c0_35] : memref<9x1x256xf32, #tpu.memory_space<vmem>>, vector<1x1x256xf32>
    %74 = vector.broadcast %73 : vector<1x1x256xf32> to vector<2x8x256xf32>
    %75 = arith.mulf %72, %74 : vector<2x8x256xf32>
    %76 = arith.addf %68, %75 : vector<2x8x256xf32>
    %c1_i32 = arith.constant 1 : i32
    %77 = tpu.dynamic_rotate %53 by %c1_i32 dim 2 : vector<2x8x256xf32>, i32 -> vector<2x8x256xf32>
    %c7 = arith.constant 7 : index
    %c0_36 = arith.constant 0 : index
    %c0_37 = arith.constant 0 : index
    %78 = vector.load %arg1[%c7, %c0_36, %c0_37] : memref<17x8x1xf32, #tpu.memory_space<vmem>>, vector<1x8x1xf32>
    %79 = vector.broadcast %78 : vector<1x8x1xf32> to vector<2x8x256xf32>
    %80 = arith.mulf %77, %79 : vector<2x8x256xf32>
    %c3 = arith.constant 3 : index
    %c0_38 = arith.constant 0 : index
    %c0_39 = arith.constant 0 : index
    %81 = vector.load %arg2[%c3, %c0_38, %c0_39] : memref<9x1x256xf32, #tpu.memory_space<vmem>>, vector<1x1x256xf32>
    %82 = vector.broadcast %81 : vector<1x1x256xf32> to vector<2x8x256xf32>
    %83 = arith.mulf %80, %82 : vector<2x8x256xf32>
    %84 = arith.addf %76, %83 : vector<2x8x256xf32>
    %c8 = arith.constant 8 : index
    %c0_40 = arith.constant 0 : index
    %c0_41 = arith.constant 0 : index
    %85 = vector.load %arg1[%c8, %c0_40, %c0_41] : memref<17x8x1xf32, #tpu.memory_space<vmem>>, vector<1x8x1xf32>
    %86 = vector.broadcast %85 : vector<1x8x1xf32> to vector<2x8x256xf32>
    %87 = arith.mulf %53, %86 : vector<2x8x256xf32>
    %c4_42 = arith.constant 4 : index
    %c0_43 = arith.constant 0 : index
    %c0_44 = arith.constant 0 : index
    %88 = vector.load %arg2[%c4_42, %c0_43, %c0_44] : memref<9x1x256xf32, #tpu.memory_space<vmem>>, vector<1x1x256xf32>
    %89 = vector.broadcast %88 : vector<1x1x256xf32> to vector<2x8x256xf32>
    %90 = arith.mulf %87, %89 : vector<2x8x256xf32>
    %91 = arith.addf %84, %90 : vector<2x8x256xf32>
    %c255_i32 = arith.constant 255 : i32
    %92 = tpu.dynamic_rotate %53 by %c255_i32 dim 2 : vector<2x8x256xf32>, i32 -> vector<2x8x256xf32>
    %c9 = arith.constant 9 : index
    %c0_45 = arith.constant 0 : index
    %c0_46 = arith.constant 0 : index
    %93 = vector.load %arg1[%c9, %c0_45, %c0_46] : memref<17x8x1xf32, #tpu.memory_space<vmem>>, vector<1x8x1xf32>
    %94 = vector.broadcast %93 : vector<1x8x1xf32> to vector<2x8x256xf32>
    %95 = arith.mulf %92, %94 : vector<2x8x256xf32>
    %c5_47 = arith.constant 5 : index
    %c0_48 = arith.constant 0 : index
    %c0_49 = arith.constant 0 : index
    %96 = vector.load %arg2[%c5_47, %c0_48, %c0_49] : memref<9x1x256xf32, #tpu.memory_space<vmem>>, vector<1x1x256xf32>
    %97 = vector.broadcast %96 : vector<1x1x256xf32> to vector<2x8x256xf32>
    %98 = arith.mulf %95, %97 : vector<2x8x256xf32>
    %99 = arith.addf %91, %98 : vector<2x8x256xf32>
    %c241_i32 = arith.constant 241 : i32
    %100 = tpu.dynamic_rotate %53 by %c241_i32 dim 2 : vector<2x8x256xf32>, i32 -> vector<2x8x256xf32>
    %c10 = arith.constant 10 : index
    %c0_50 = arith.constant 0 : index
    %c0_51 = arith.constant 0 : index
    %101 = vector.load %arg1[%c10, %c0_50, %c0_51] : memref<17x8x1xf32, #tpu.memory_space<vmem>>, vector<1x8x1xf32>
    %102 = vector.broadcast %101 : vector<1x8x1xf32> to vector<2x8x256xf32>
    %103 = arith.mulf %100, %102 : vector<2x8x256xf32>
    %c6_52 = arith.constant 6 : index
    %c0_53 = arith.constant 0 : index
    %c0_54 = arith.constant 0 : index
    %104 = vector.load %arg2[%c6_52, %c0_53, %c0_54] : memref<9x1x256xf32, #tpu.memory_space<vmem>>, vector<1x1x256xf32>
    %105 = vector.broadcast %104 : vector<1x1x256xf32> to vector<2x8x256xf32>
    %106 = arith.mulf %103, %105 : vector<2x8x256xf32>
    %107 = arith.addf %99, %106 : vector<2x8x256xf32>
    %c240_i32 = arith.constant 240 : i32
    %108 = tpu.dynamic_rotate %53 by %c240_i32 dim 2 : vector<2x8x256xf32>, i32 -> vector<2x8x256xf32>
    %c11 = arith.constant 11 : index
    %c0_55 = arith.constant 0 : index
    %c0_56 = arith.constant 0 : index
    %109 = vector.load %arg1[%c11, %c0_55, %c0_56] : memref<17x8x1xf32, #tpu.memory_space<vmem>>, vector<1x8x1xf32>
    %110 = vector.broadcast %109 : vector<1x8x1xf32> to vector<2x8x256xf32>
    %111 = arith.mulf %108, %110 : vector<2x8x256xf32>
    %c7_57 = arith.constant 7 : index
    %c0_58 = arith.constant 0 : index
    %c0_59 = arith.constant 0 : index
    %112 = vector.load %arg2[%c7_57, %c0_58, %c0_59] : memref<9x1x256xf32, #tpu.memory_space<vmem>>, vector<1x1x256xf32>
    %113 = vector.broadcast %112 : vector<1x1x256xf32> to vector<2x8x256xf32>
    %114 = arith.mulf %111, %113 : vector<2x8x256xf32>
    %115 = arith.addf %107, %114 : vector<2x8x256xf32>
    %c239_i32 = arith.constant 239 : i32
    %116 = tpu.dynamic_rotate %53 by %c239_i32 dim 2 : vector<2x8x256xf32>, i32 -> vector<2x8x256xf32>
    %c12 = arith.constant 12 : index
    %c0_60 = arith.constant 0 : index
    %c0_61 = arith.constant 0 : index
    %117 = vector.load %arg1[%c12, %c0_60, %c0_61] : memref<17x8x1xf32, #tpu.memory_space<vmem>>, vector<1x8x1xf32>
    %118 = vector.broadcast %117 : vector<1x8x1xf32> to vector<2x8x256xf32>
    %119 = arith.mulf %116, %118 : vector<2x8x256xf32>
    %c8_62 = arith.constant 8 : index
    %c0_63 = arith.constant 0 : index
    %c0_64 = arith.constant 0 : index
    %120 = vector.load %arg2[%c8_62, %c0_63, %c0_64] : memref<9x1x256xf32, #tpu.memory_space<vmem>>, vector<1x1x256xf32>
    %121 = vector.broadcast %120 : vector<1x1x256xf32> to vector<2x8x256xf32>
    %122 = arith.mulf %119, %121 : vector<2x8x256xf32>
    %123 = arith.addf %115, %122 : vector<2x8x256xf32>
    %cst_65 = arith.constant dense<0.000000e+00> : vector<2x8xf32>
    %124 = vector.multi_reduction <add>, %123, %cst_65 [2] : vector<2x8x256xf32> to vector<2x8xf32>
    %125 = vector.shape_cast %124 : vector<2x8xf32> to vector<2x8x1xf32>
    %126 = arith.mulf %123, %123 : vector<2x8x256xf32>
    %cst_66 = arith.constant dense<0.000000e+00> : vector<2x8xf32>
    %127 = vector.multi_reduction <add>, %126, %cst_66 [2] : vector<2x8x256xf32> to vector<2x8xf32>
    %128 = vector.shape_cast %127 : vector<2x8xf32> to vector<2x8x1xf32>
    %129 = vector.extract_strided_slice %125 {offsets = [0, 0, 0], sizes = [1, 8, 1], strides = [1, 1, 1]} : vector<2x8x1xf32> to vector<1x8x1xf32>
    %130 = vector.extract_strided_slice %128 {offsets = [0, 0, 0], sizes = [1, 8, 1], strides = [1, 1, 1]} : vector<2x8x1xf32> to vector<1x8x1xf32>
    %131 = vector.extract_strided_slice %125 {offsets = [1, 0, 0], sizes = [1, 8, 1], strides = [1, 1, 1]} : vector<2x8x1xf32> to vector<1x8x1xf32>
    %132 = arith.addf %129, %131 : vector<1x8x1xf32>
    %133 = vector.extract_strided_slice %128 {offsets = [1, 0, 0], sizes = [1, 8, 1], strides = [1, 1, 1]} : vector<2x8x1xf32> to vector<1x8x1xf32>
    %134 = arith.addf %130, %133 : vector<1x8x1xf32>
    %cst_67 = arith.constant 0.001953125 : f32
    %135 = vector.broadcast %cst_67 : f32 to vector<1x8x1xf32>
    %136 = arith.mulf %132, %135 : vector<1x8x1xf32>
    %cst_68 = arith.constant 0.001953125 : f32
    %137 = vector.broadcast %cst_68 : f32 to vector<1x8x1xf32>
    %138 = arith.mulf %134, %137 : vector<1x8x1xf32>
    %139 = arith.mulf %136, %136 : vector<1x8x1xf32>
    %140 = arith.subf %138, %139 : vector<1x8x1xf32>
    %cst_69 = arith.constant 1.000000e-03 : f32
    %141 = vector.broadcast %cst_69 : f32 to vector<1x8x1xf32>
    %142 = arith.addf %140, %141 : vector<1x8x1xf32>
    %143 = math.rsqrt %142 : vector<1x8x1xf32>
    %c2_70 = arith.constant 2 : index
    %c0_71 = arith.constant 0 : index
    %c0_72 = arith.constant 0 : index
    %144 = vector.load %arg1[%c2_70, %c0_71, %c0_72] : memref<17x8x1xf32, #tpu.memory_space<vmem>>, vector<1x8x1xf32>
    %145 = arith.mulf %143, %144 : vector<1x8x1xf32>
    %146 = vector.broadcast %145 : vector<1x8x1xf32> to vector<2x8x256xf32>
    %147 = arith.mulf %123, %146 : vector<2x8x256xf32>
    %c3_73 = arith.constant 3 : index
    %c0_74 = arith.constant 0 : index
    %c0_75 = arith.constant 0 : index
    %148 = vector.load %arg1[%c3_73, %c0_74, %c0_75] : memref<17x8x1xf32, #tpu.memory_space<vmem>>, vector<1x8x1xf32>
    %149 = arith.mulf %136, %145 : vector<1x8x1xf32>
    %150 = arith.subf %148, %149 : vector<1x8x1xf32>
    %151 = vector.broadcast %150 : vector<1x8x1xf32> to vector<2x8x256xf32>
    %152 = arith.addf %147, %151 : vector<2x8x256xf32>
    %cst_76 = arith.constant 0.000000e+00 : f32
    %153 = vector.broadcast %cst_76 : f32 to vector<2x8x256xf32>
    %154 = arith.maximumf %152, %153 : vector<2x8x256xf32>
    %c0_77 = arith.constant 0 : index
    %c4_78 = arith.constant 4 : index
    %c0_79 = arith.constant 0 : index
    %155 = vector.load %arg3[%c0_77, %c4_78, %c0_79] : memref<2x12x256xf32, #tpu.memory_space<vmem>>, vector<2x8x256xf32>
    tpu.vector_store %arg3[%c0_77, %c4_78, %c0_79], %154 {strides = array<i32>} : memref<2x12x256xf32, #tpu.memory_space<vmem>>, vector<2x8x256xf32>,
    return
  }
}

</mosaic_0001>

<bundles_post_ra>
// kernel: _lambda_.1
= control target key start
LH: loop header
LB: loop body
LE: loop exit
PB: predicated region body
PF: predicated region fallthrough
CT: control target
= control target key end

     0   :  { %8 = vsyncpa [#allocation3], 0  ;;  %s815_s12 = smov [#allocation2]   ;;  %s1074_s0 = inlined_call_operand.vmem [shape: f32[2,4,256], index: 0, kind: input, shape index: {}]   ;;  %s1075_s1 = inlined_call_operand.vmem [shape: f32[17,8,1], index: 1, kind: input, shape index: {}]   ;;  %s1076_s2 = inlined_call_operand.hbm [shape: f32[9,1,256], index: 2, kind: input, shape index: {}]   ;;  %s1077_s3 = inlined_call_operand.vmem [shape: f32[2,12,256], index: 3, kind: output, shape index: {}]  }
   0x1   :  { %s18_s13 = sshll.u32 %s815_s12, 4  ;;  %s791_s16 = scalar_lea.hbm %s1076_s2, 288  ;;  %s19_s13 = int_to_ptr.vmem [resolvable:$true] %s18_s13 }
   0x2   :  { %p792_p0 = scmp.ne.s32.totalorder %s1076_s2, %s791_s16  ;;  %p795_p1 = scmp.lt.u32.totalorder %s791_s16, %s1076_s2 }
   0x4   :  { %p797_p2 = pnand %p795_p1, %p792_p0 }
   0x6   :  { %800 = shalt.err (!%p797_p2)
}
   0x7   :  { %s801_s21 = scalar_lea.vmem %s19_s13, 288  ;;  %p806_p4 = scmp.lt.s32.totalorder %s19_s13, %s19_s13 }
   0x8   :  { %p802_p3 = scmp.ne.s32.totalorder %s19_s13, %s801_s21  ;;  %p807_p5 = scmp.lt.s32.totalorder %s801_s21, %s801_s21 }
   0xa   :  { %p808_p6 = por %p807_p5, %p806_p4 }
   0xc   :  { %p809_p7 = pnand %p808_p6, %p802_p3 }
   0xe   :  { %812 = shalt.err (!%p809_p7)
}
   0xf   :  { %s816_s22 = smov 32   ;;  %s817_s23 = smov 2  }
  0x10   :  { %24 = dma.hbm_to_vmem [thread:$0]  %s1076_s2, 288, %s19_s13, [#allocation3], %s816_s22, %s816_s22, %s817_s23  }
  0x11   :  { %813 = dma.done.wait [#allocation3], 288  }
  0x12   :  { %814 = vsyncadd [#allocation3], 4294967008  ;;  %v818_v0 = vmov 0   ;;  %v757_v1 = vld [vmem:[%s1075_s1 + $0x78] sm:$0xff]  ;;  %v755_v2 = vld [vmem:[%s1075_s1 + $0x68] sm:$0xff]  ;;  %v42_v9 = vlaneseq  ;;  %s819_s11 = smov 17  }
  0x13   :  { %784 = vset.pattern.permute.xlu1 %v818_v0  ;;  %783 = vset.pattern.permute.xlu0 %v818_v0  ;;  %v28_v3 = vld [vmem:[%s1074_s0] sm:$0xff]  ;;  %v29_v4 = vld [vmem:[%s1074_s0 + $0x8] sm:$0xff]  ;;  %v756_v6 = vld [vmem:[%s1075_s1 + $0x70] sm:$0xff]  ;;  %s820_s12 = smov 16   ;;  %s821_s13 = smov 15  }
  0x14   :  { %178 = vperm.xlu1 %784, %v757_v1   ;;  %80 = vperm.xlu0 %783, %v755_v2   ;;  %v758_v5 = vld [vmem:[%s1075_s1 + $0x80] sm:$0xff]  ;;  %v32_v7 = vcombine.high %v28_v3, %v28_v3  ;;  %v33_v8 = vcombine.high %v29_v4, %v29_v4  ;;  %36 = vst [vmem:[%s1077_s3] sm:$0xf] %v28_v3  ;;  %38 = vst [vmem:[%s1077_s3 + $0x20] sm:$0xf] %v29_v4  ;;  %v43_v10 = vshrl.u32 %v42_v9, 7  ;;  %s822_s14 = smov 1  }
  0x15   :  { %s823_s0 = smov 127   ;;  %s824_s15 = smov 113  }
  0x16   :  { %37 = vst [vmem:[%s1077_s3 + $0x8] sm:$0xf] %v32_v7  ;;  %39 = vst [vmem:[%s1077_s3 + $0x28] sm:$0xf] %v33_v8  ;;  %v890_v11 = vsub.s32 0, %v43_v10  ;;  %v48_v12 = vsub.s32 4, %v43_v10 }
  0x17   :  { %v892_v13 = vsub.s32 1, %v43_v10  ;;  %v95_v14 = vsub.s32 5, %v43_v10  ;;  %v142_v15 = vsub.s32 2, %v43_v10  ;;  %v146_v16 = vsub.s32 6, %v43_v10  ;;  %s825_s16 = smov 112   ;;  %s826_s17 = smov 111  }
  0x18   :  { %229 = vperm.xlu1 %784, %v758_v5   ;;  %127 = vperm.xlu0 %783, %v756_v6   ;;  %v193_v17 = vsub.s32 3, %v43_v10  ;;  %v197_v18 = vsub.s32 7, %v43_v10  ;;  %v45_v19 = vrot.slane %v28_v3, %v890_v11  ;;  %v49_v20 = vrot.slane %v28_v3, %v48_v12 }
  0x19   :  { %v53_v21 = vrot.slane %v29_v4, %v890_v11  ;;  %v57_v22 = vrot.slane %v29_v4, %v48_v12  ;;  %v92_v23 = vrot.slane %v28_v3, %v892_v13  ;;  %v96_v24 = vrot.slane %v28_v3, %v95_v14 }
  0x1a   :  { %v100_v25 = vrot.slane %v29_v4, %v892_v13  ;;  %v104_v26 = vrot.slane %v29_v4, %v95_v14  ;;  %v143_v27 = vrot.slane %v28_v3, %v142_v15  ;;  %v147_v28 = vrot.slane %v28_v3, %v146_v16 }
  0x1b   :  { %v151_v29 = vrot.slane %v29_v4, %v142_v15  ;;  %v155_v30 = vrot.slane %v29_v4, %v146_v16  ;;  %v194_v33 = vrot.slane %v28_v3, %v193_v17  ;;  %v198_v34 = vrot.slane %v28_v3, %v197_v18 }
  0x1c   :  { %v202_v35 = vrot.slane %v29_v4, %v193_v17  ;;  %v206_v36 = vrot.slane %v29_v4, %v197_v18  ;;  %v65_v37 = vrot.slane %v45_v19, %v890_v11  ;;  %v69_v38 = vrot.slane %v49_v20, %v890_v11 }
  0x1d   :  { %v73_v39 = vrot.slane %v53_v21, %v890_v11  ;;  %v77_v40 = vrot.slane %v57_v22, %v890_v11  ;;  %v112_v41 = vrot.slane %v92_v23, %v892_v13  ;;  %v116_v42 = vrot.slane %v96_v24, %v892_v13 }
  0x1e   :  { %v120_v43 = vrot.slane %v100_v25, %v892_v13  ;;  %v124_v44 = vrot.slane %v104_v26, %v892_v13  ;;  %v163_v45 = vrot.slane %v143_v27, %v142_v15  ;;  %v167_v46 = vrot.slane %v147_v28, %v142_v15 }
  0x1f   :  { %v171_v47 = vrot.slane %v151_v29, %v142_v15  ;;  %v175_v48 = vrot.slane %v155_v30, %v142_v15  ;;  %v214_v49 = vrot.slane %v194_v33, %v193_v17  ;;  %v218_v50 = vrot.slane %v198_v34, %v193_v17 }
  0x20   :  { %v222_v51 = vrot.slane %v202_v35, %v193_v17  ;;  %v226_v52 = vrot.slane %v206_v36, %v193_v17 }
  0x93   :  { %v179_v31 = vpop.permute.xlu1 %178  ;;  %v81_v32 = vpop.permute.xlu0 %80 }
  0x94   :  { %v83_v54 = vmul.f32 %v81_v32, %v65_v37  ;;  %v84_v55 = vmul.f32 %v81_v32, %v69_v38  ;;  %v85_v56 = vmul.f32 %v81_v32, %v73_v39  ;;  %v86_v57 = vmul.f32 %v81_v32, %v77_v40 }
  0x95   :  { %v181_v63 = vmul.f32 %v179_v31, %v163_v45  ;;  %v182_v0 = vmul.f32 %v179_v31, %v167_v46  ;;  %v183_v1 = vmul.f32 %v179_v31, %v171_v47  ;;  %v184_v2 = vmul.f32 %v179_v31, %v175_v48  ;;  %v760_v46 = vld [vmem:[%s1075_s1 + $0x20] sm:$0xff]  ;;  %v761_v48 = vld [vmem:[%s1075_s1 + $0x28] sm:$0xff] }
  0x97   :  { %v128_v53 = vpop.permute.xlu0 %127  ;;  %v230_v58 = vpop.permute.xlu1 %229 }
  0x98   :  { %v130_v59 = vmul.f32 %v128_v53, %v112_v41  ;;  %v131_v60 = vmul.f32 %v128_v53, %v116_v42  ;;  %v132_v61 = vmul.f32 %v128_v53, %v120_v43  ;;  %v133_v62 = vmul.f32 %v128_v53, %v124_v44  ;;  %v264_v41 = vld [vmem:[%s1075_s1] sm:$0xff]  ;;  %v759_v44 = vld [vmem:[%s1075_s1 + $0x8] sm:$0xff]  ;;  %v766_v53 = vld [vmem:[%s1075_s1 + $0x50] sm:$0xff] }
  0x99   :  { %v232_v7 = vmul.f32 %v230_v58, %v214_v49  ;;  %v233_v8 = vmul.f32 %v230_v58, %v218_v50  ;;  %v234_v10 = vmul.f32 %v230_v58, %v222_v51  ;;  %v235_v12 = vmul.f32 %v230_v58, %v226_v52  ;;  %v762_v49 = vld [vmem:[%s1075_s1 + $0x30] sm:$0xff]  ;;  %v763_v50 = vld [vmem:[%s1075_s1 + $0x38] sm:$0xff]  ;;  %v764_v51 = vld [vmem:[%s1075_s1 + $0x40] sm:$0xff] }
  0x9a   :  { %v134_v3 = vadd.f32 %v130_v59, %v83_v54  ;;  %v135_v4 = vadd.f32 %v131_v60, %v84_v55  ;;  %v136_v5 = vadd.f32 %v132_v61, %v85_v56  ;;  %v137_v6 = vadd.f32 %v133_v62, %v86_v57  ;;  %v765_v52 = vld [vmem:[%s1075_s1 + $0x48] sm:$0xff]  ;;  %v767_v54 = vld [vmem:[%s1075_s1 + $0x58] sm:$0xff]  ;;  %v768_v55 = vld [vmem:[%s1075_s1 + $0x60] sm:$0xff] }
  0x9c   :  { %v187_v14 = vadd.f32 %v183_v1, %v136_v5  ;;  %v188_v15 = vadd.f32 %v184_v2, %v137_v6  ;;  %v185_v16 = vadd.f32 %v181_v63, %v134_v3  ;;  %v186_v17 = vadd.f32 %v182_v0, %v135_v4 }
  0x9e   :  { %v238_v18 = vadd.f32 %v234_v10, %v187_v14  ;;  %v239_v19 = vadd.f32 %v235_v12, %v188_v15  ;;  %v236_v20 = vadd.f32 %v232_v7, %v185_v16  ;;  %v237_v21 = vadd.f32 %v233_v8, %v186_v17 }
  0xa0   :  { %v243_v22 = vadd.f32 %v239_v19, %v238_v18  ;;  %v240_v23 = vadd.f32 %v237_v21, %v236_v20  ;;  %v246_v24 = vmul.f32 %v236_v20, %v236_v20  ;;  %v247_v25 = vmul.f32 %v237_v21, %v237_v21 }
  0xa1   :  { %v248_v27 = vmul.f32 %v238_v18, %v238_v18  ;;  %v249_v28 = vmul.f32 %v239_v19, %v239_v19 }
  0xa2   :  { %244 = vadd.xlane.f32.xlu1 %v243_v22  ;;  %241 = vadd.xlane.f32.xlu0 %v240_v23  ;;  %v250_v26 = vadd.f32 %v247_v25, %v246_v24  ;;  %v960_v22 = vand.u32 127, %v42_v9 }
  0xa3   :  { %v253_v29 = vadd.f32 %v249_v28, %v248_v27 }
  0xa4   :  { %vm338_vm0 = vcmp.lt.s32.totalorder %v960_v22, 16  ;;  %vm298_vm1 = vcmp.lt.s32.totalorder %v960_v22, 17  ;;  %vm383_vm2 = vcmp.lt.s32.totalorder %v960_v22, 15  ;;  %vm428_vm3 = vcmp.lt.s32.totalorder %v960_v22, 1 }
  0xa5   :  { %vm505_vm4 = vcmp.lt.s32.totalorder %v960_v22, 127  ;;  %vm550_vm5 = vcmp.lt.s32.totalorder %v960_v22, 113  ;;  %vm595_vm6 = vcmp.lt.s32.totalorder %v960_v22, 112  ;;  %vm640_vm7 = vcmp.lt.s32.totalorder %v960_v22, 111 }
  0xa6   :  { %251 = vadd.xlane.f32.xlu0 %v250_v26  ;;  %v355_v26 = vld [vmem:[#allocation2 + $0x2] sm:$0x3] }
  0xaa   :  { %254 = vadd.xlane.f32.xlu0 %v253_v29 }
 0x12f   :  { %v245_v30 = vpop.xlane.xlu1 %244  ;;  %v242_v31 = vpop.xlane.xlu0 %241 }
 0x130   :  { %v256_v32 = vadd.f32 %v245_v30, %v242_v31  ;;  %v314_v30 = vld [vmem:[#allocation2] sm:$0x3] }
 0x132   :  { %v258_v34 = vmul.f32 0.001953125, %v256_v32  ;;  %v360_v32 = vrot.slane %v355_v26, %v890_v11 }
 0x133   :  { %v252_v33 = vpop.xlane.xlu0 %251 }
 0x134   :  { %v260_v37 = vmul.f32 %v258_v34, %v258_v34 }
 0x137   :  { %v255_v35 = vpop.xlane.xlu0 %254 }
 0x138   :  { %v257_v36 = vadd.f32 %v255_v35, %v252_v33  ;;  %v364_v33 = vrot.slane %v355_v26, %v892_v13  ;;  %v445_v26 = vld [vmem:[#allocation2 + $0x6] sm:$0x3] }
 0x13a   :  { %v259_v38 = vmul.f32 0.001953125, %v257_v36 }
 0x13c   :  { %v261_v39 = vsub.f32 %v259_v38, %v260_v37  ;;  %v400_v37 = vld [vmem:[#allocation2 + $0x4] sm:$0x3]  ;;  %v319_v38 = vrot.slane %v314_v30, %v890_v11 }
 0x13e   :  { %v262_v40 = vadd.f32 0.001, %v261_v39  ;;  %v323_v39 = vrot.slane %v314_v30, %v892_v13 }
 0x140   :  { %787 = vrsqrt.f32 %v262_v40 }
 0x14a   :  { %v788_v42 = vpop.eup %787 }
 0x14b   :  { %v265_v43 = vmul.f32 %v788_v42, %v264_v41 }
 0x14d   :  { %268 = vperm.xlu1 %784, %v265_v43   ;;  %v277_v45 = vmul.f32 %v265_v43, %v258_v34  ;;  %v405_v43 = vrot.slane %v400_v37, %v890_v11 }
 0x14f   :  { %v278_v47 = vsub.f32 %v759_v44, %v277_v45  ;;  %v409_v44 = vrot.slane %v400_v37, %v892_v13 }
 0x151   :  { %307 = vperm.xlu1 %784, %v760_v46   ;;  %281 = vperm.xlu0 %783, %v278_v47  }
 0x155   :  { %347 = vperm.xlu1 %784, %v761_v48   ;;  %392 = vperm.xlu0 %783, %v762_v49  }
 0x159   :  { %437 = vperm.xlu1 %784, %v763_v50   ;;  %469 = vperm.xlu0 %783, %v764_v51  }
 0x15d   :  { %514 = vperm.xlu1 %784, %v765_v52   ;;  %559 = vperm.xlu0 %783, %v766_v53  }
 0x161   :  { %604 = vperm.xlu1 %784, %v767_v54   ;;  %649 = vperm.xlu0 %783, %v768_v55  }
 0x1cc   :  { %v269_v56 = vpop.permute.xlu1 %268 }
 0x1cd   :  { %v271_v57 = vmul.f32 %v269_v56, %v236_v20  ;;  %v273_v58 = vmul.f32 %v269_v56, %v238_v18  ;;  %v272_v62 = vmul.f32 %v269_v56, %v237_v21  ;;  %v274_v63 = vmul.f32 %v269_v56, %v239_v19 }
 0x1d0   :  { %v282_v59 = vpop.permute.xlu0 %281  ;;  %v308_v8 = vpop.permute.xlu1 %307 }
 0x1d1   :  { %v284_v60 = vadd.f32 %v282_v59, %v271_v57  ;;  %v286_v61 = vadd.f32 %v282_v59, %v273_v58  ;;  %v285_v1 = vadd.f32 %v282_v59, %v272_v62  ;;  %v287_v2 = vadd.f32 %v282_v59, %v274_v63  ;;  %v477_v59 = vld [vmem:[#allocation2 + $0x8] sm:$0x3] }
 0x1d3   :  { %290 = vrot.lane.b32.xlu1 %v286_v61, %s819_s11  ;;  %288 = vrot.lane.b32.xlu0 %v284_v60, %s819_s11 }
 0x1d4   :  { %v939_v0 = vpop.permute.xlu0 %392  ;;  %v348_v10 = vpop.permute.xlu1 %347 }
 0x1d7   :  { %294 = vrot.lane.b32.xlu1 %v287_v2, %s819_s11  ;;  %292 = vrot.lane.b32.xlu0 %v285_v1, %s819_s11 }
 0x1d8   :  { %v470_v3 = vpop.permute.xlu0 %469  ;;  %v949_v12 = vpop.permute.xlu1 %437 }
 0x1d9   :  { %v941_v4 = vmul.f32 %v470_v3, %v284_v60  ;;  %v943_v5 = vmul.f32 %v470_v3, %v285_v1  ;;  %v945_v6 = vmul.f32 %v470_v3, %v286_v61  ;;  %v947_v7 = vmul.f32 %v470_v3, %v287_v2 }
 0x1db   :  { %332 = vrot.lane.b32.xlu1 %v286_v61, %s820_s12  ;;  %330 = vrot.lane.b32.xlu0 %v284_v60, %s820_s12 }
 0x1dc   :  { %v951_v14 = vpop.permute.xlu1 %514  ;;  %v953_v15 = vpop.permute.xlu0 %559 }
 0x1df   :  { %336 = vrot.lane.b32.xlu1 %v287_v2, %s820_s12  ;;  %334 = vrot.lane.b32.xlu0 %v285_v1, %s820_s12 }
 0x1e0   :  { %v955_v16 = vpop.permute.xlu1 %604  ;;  %v957_v17 = vpop.permute.xlu0 %649 }
 0x1e3   :  { %375 = vrot.lane.b32.xlu1 %v284_v60, %s821_s13  ;;  %377 = vrot.lane.b32.xlu0 %v286_v61, %s821_s13 }
 0x1e7   :  { %379 = vrot.lane.b32.xlu1 %v285_v1, %s821_s13  ;;  %381 = vrot.lane.b32.xlu0 %v287_v2, %s821_s13 }
 0x1eb   :  { %422 = vrot.lane.b32.xlu1 %v286_v61, %s822_s14  ;;  %420 = vrot.lane.b32.xlu0 %v284_v60, %s822_s14 }
 0x1ef   :  { %426 = vrot.lane.b32.xlu1 %v287_v2, %s822_s14  ;;  %424 = vrot.lane.b32.xlu0 %v285_v1, %s822_s14 }
 0x1f3   :  { %499 = vrot.lane.b32.xlu1 %v286_v61, %s823_s0  ;;  %497 = vrot.lane.b32.xlu0 %v284_v60, %s823_s0 }
 0x1f7   :  { %503 = vrot.lane.b32.xlu1 %v287_v2, %s823_s0  ;;  %501 = vrot.lane.b32.xlu0 %v285_v1, %s823_s0 }
 0x1fb   :  { %542 = vrot.lane.b32.xlu1 %v284_v60, %s824_s15  ;;  %544 = vrot.lane.b32.xlu0 %v286_v61, %s824_s15 }
 0x1ff   :  { %546 = vrot.lane.b32.xlu1 %v285_v1, %s824_s15  ;;  %548 = vrot.lane.b32.xlu0 %v287_v2, %s824_s15 }
 0x203   :  { %587 = vrot.lane.b32.xlu1 %v284_v60, %s825_s16  ;;  %589 = vrot.lane.b32.xlu0 %v286_v61, %s825_s16 }
 0x207   :  { %591 = vrot.lane.b32.xlu1 %v285_v1, %s825_s16  ;;  %593 = vrot.lane.b32.xlu0 %v287_v2, %s825_s16 }
 0x20b   :  { %632 = vrot.lane.b32.xlu1 %v284_v60, %s826_s17  ;;  %634 = vrot.lane.b32.xlu0 %v286_v61, %s826_s17 }
 0x20f   :  { %636 = vrot.lane.b32.xlu1 %v285_v1, %s826_s17  ;;  %638 = vrot.lane.b32.xlu0 %v287_v2, %s826_s17 }
 0x245   :  { %v291_v18 = vpop.permute.xlu1 %290  ;;  %v289_v19 = vpop.permute.xlu0 %288 }
 0x249   :  { %v295_v20 = vpop.permute.xlu1 %294  ;;  %v293_v21 = vpop.permute.xlu0 %292 }
 0x24a   :  { %v300_v9 = vsel %vm298_vm1, %v291_v18, %v295_v20  ;;  %v302_v31 = vsel %vm298_vm1, %v295_v20, %v291_v18  ;;  %v299_v52 = vsel %vm298_vm1, %v289_v19, %v293_v21  ;;  %v301_v53 = vsel %vm298_vm1, %v293_v21, %v289_v19 }
 0x24b   :  { %v312_v40 = vmul.f32 %v308_v8, %v302_v31  ;;  %v313_v41 = vmul.f32 %v308_v8, %v300_v9  ;;  %v310_v1 = vmul.f32 %v308_v8, %v301_v53  ;;  %v311_v2 = vmul.f32 %v308_v8, %v299_v52 }
 0x24d   :  { %v333_v23 = vpop.permute.xlu1 %332  ;;  %v331_v24 = vpop.permute.xlu0 %330  ;;  %v328_v50 = vmul.f32 %v319_v38, %v312_v40  ;;  %v329_v51 = vmul.f32 %v323_v39, %v313_v41  ;;  %v326_v9 = vmul.f32 %v319_v38, %v310_v1  ;;  %v327_v31 = vmul.f32 %v323_v39, %v311_v2 }
 0x251   :  { %v337_v25 = vpop.permute.xlu1 %336  ;;  %v335_v29 = vpop.permute.xlu0 %334 }
 0x252   :  { %v340_v27 = vsel %vm338_vm0, %v333_v23, %v337_v25  ;;  %v342_v28 = vsel %vm338_vm0, %v337_v25, %v333_v23  ;;  %v339_v47 = vsel %vm338_vm0, %v331_v24, %v335_v29  ;;  %v341_v48 = vsel %vm338_vm0, %v335_v29, %v331_v24 }
 0x253   :  { %v352_v34 = vmul.f32 %v348_v10, %v342_v28  ;;  %v353_v35 = vmul.f32 %v348_v10, %v340_v27  ;;  %v350_v60 = vmul.f32 %v348_v10, %v341_v48  ;;  %v351_v61 = vmul.f32 %v348_v10, %v339_v47 }
 0x254   :  { %v482_v27 = vrot.slane %v477_v59, %v890_v11  ;;  %v486_v10 = vrot.slane %v477_v59, %v892_v13 }
 0x255   :  { %v376_v36 = vpop.permute.xlu1 %375  ;;  %v378_v42 = vpop.permute.xlu0 %377  ;;  %v369_v45 = vmul.f32 %v360_v32, %v352_v34  ;;  %v370_v46 = vmul.f32 %v364_v33, %v353_v35  ;;  %v367_v28 = vmul.f32 %v360_v32, %v350_v60  ;;  %v368_v29 = vmul.f32 %v364_v33, %v351_v61 }
 0x256   :  { %v450_v34 = vrot.slane %v445_v26, %v890_v11  ;;  %v491_v47 = vmul.f32 %v482_v27, %v945_v6  ;;  %v489_v60 = vmul.f32 %v482_v27, %v941_v4 }
 0x257   :  { %v373_v3 = vadd.f32 %v369_v45, %v328_v50  ;;  %v374_v18 = vadd.f32 %v370_v46, %v329_v51  ;;  %v371_v45 = vadd.f32 %v367_v28, %v326_v9 }
 0x259   :  { %v380_v49 = vpop.permute.xlu1 %379  ;;  %v382_v54 = vpop.permute.xlu0 %381 }
 0x25a   :  { %v384_v55 = vsel %vm383_vm2, %v376_v36, %v380_v49  ;;  %v386_v56 = vsel %vm383_vm2, %v380_v49, %v376_v36  ;;  %v385_v57 = vsel %vm383_vm2, %v378_v42, %v382_v54  ;;  %v387_v58 = vsel %vm383_vm2, %v382_v54, %v378_v42 }
 0x25b   :  { %v397_v62 = vmul.f32 %v939_v0, %v387_v58  ;;  %v398_v63 = vmul.f32 %v939_v0, %v385_v57  ;;  %v395_v20 = vmul.f32 %v939_v0, %v386_v56  ;;  %v396_v21 = vmul.f32 %v939_v0, %v384_v55  ;;  %v522_v56 = vld [vmem:[#allocation2 + $0xa] sm:$0x3] }
 0x25c   :  { %v454_v0 = vrot.slane %v445_v26, %v892_v13  ;;  %v492_v57 = vmul.f32 %v486_v10, %v947_v7 }
 0x25d   :  { %v423_v19 = vpop.permute.xlu1 %422  ;;  %v414_v23 = vmul.f32 %v405_v43, %v397_v62  ;;  %v415_v24 = vmul.f32 %v409_v44, %v398_v63  ;;  %v421_v25 = vpop.permute.xlu0 %420  ;;  %v412_v36 = vmul.f32 %v405_v43, %v395_v20  ;;  %v413_v37 = vmul.f32 %v409_v44, %v396_v21 }
 0x25e   :  { %v372_v43 = vadd.f32 %v368_v29, %v327_v31  ;;  %v527_v62 = vrot.slane %v522_v56, %v890_v11  ;;  %v531_v63 = vrot.slane %v522_v56, %v892_v13 }
 0x25f   :  { %v418_v8 = vadd.f32 %v414_v23, %v373_v3  ;;  %v419_v30 = vadd.f32 %v415_v24, %v374_v18  ;;  %v416_v51 = vadd.f32 %v412_v36, %v371_v45 }
 0x260   :  { %v417_v52 = vadd.f32 %v413_v37, %v372_v43 }
 0x261   :  { %v427_v35 = vpop.permute.xlu1 %426  ;;  %v425_v42 = vpop.permute.xlu0 %424 }
 0x262   :  { %v430_v40 = vsel %vm428_vm3, %v423_v19, %v427_v35  ;;  %v432_v41 = vsel %vm428_vm3, %v427_v35, %v423_v19  ;;  %v429_v38 = vsel %vm428_vm3, %v421_v25, %v425_v42  ;;  %v431_v39 = vsel %vm428_vm3, %v425_v42, %v421_v25 }
 0x263   :  { %v442_v32 = vmul.f32 %v949_v12, %v432_v41  ;;  %v443_v33 = vmul.f32 %v949_v12, %v430_v40  ;;  %v440_v44 = vmul.f32 %v949_v12, %v431_v39  ;;  %v441_v46 = vmul.f32 %v949_v12, %v429_v38 }
 0x264   :  { %v490_v12 = vmul.f32 %v486_v10, %v943_v5 }
 0x265   :  { %v459_v48 = vmul.f32 %v450_v34, %v442_v32  ;;  %v460_v49 = vmul.f32 %v454_v0, %v443_v33  ;;  %v500_v50 = vpop.permute.xlu1 %499  ;;  %v457_v53 = vmul.f32 %v450_v34, %v440_v44  ;;  %v458_v54 = vmul.f32 %v454_v0, %v441_v46  ;;  %v498_v55 = vpop.permute.xlu0 %497 }
 0x267   :  { %v463_v58 = vadd.f32 %v459_v48, %v418_v8  ;;  %v464_v59 = vadd.f32 %v460_v49, %v419_v30  ;;  %v461_v6 = vadd.f32 %v457_v53, %v416_v51  ;;  %v462_v61 = vadd.f32 %v458_v54, %v417_v52  ;;  %v567_v8 = vld [vmem:[#allocation2 + $0xc] sm:$0x3]  ;;  %v612_v53 = vld [vmem:[#allocation2 + $0xe] sm:$0x3] }
 0x268   :  { %v572_v0 = vrot.slane %v567_v8, %v890_v11  ;;  %v576_v35 = vrot.slane %v567_v8, %v892_v13 }
 0x269   :  { %v504_v1 = vpop.permute.xlu1 %503  ;;  %v495_v2 = vadd.f32 %v491_v47, %v463_v58  ;;  %v496_v3 = vadd.f32 %v492_v57, %v464_v59  ;;  %v493_v19 = vadd.f32 %v489_v60, %v461_v6  ;;  %v494_v20 = vadd.f32 %v490_v12, %v462_v61  ;;  %v502_v4 = vpop.permute.xlu0 %501 }
 0x26a   :  { %v507_v7 = vsel %vm505_vm4, %v500_v50, %v504_v1  ;;  %v509_v18 = vsel %vm505_vm4, %v504_v1, %v500_v50  ;;  %v506_v23 = vsel %vm505_vm4, %v498_v55, %v502_v4  ;;  %v508_v24 = vsel %vm505_vm4, %v502_v4, %v498_v55 }
 0x26b   :  { %v519_v5 = vmul.f32 %v951_v14, %v507_v7  ;;  %v520_v21 = vmul.f32 %v951_v14, %v509_v18  ;;  %v517_v27 = vmul.f32 %v951_v14, %v506_v23  ;;  %v518_v10 = vmul.f32 %v951_v14, %v508_v24 }
 0x26c   :  { %v617_v57 = vrot.slane %v612_v53, %v890_v11 }
 0x26d   :  { %v536_v25 = vmul.f32 %v527_v62, %v519_v5  ;;  %v537_v26 = vmul.f32 %v531_v63, %v520_v21  ;;  %v543_v28 = vpop.permute.xlu1 %542  ;;  %v545_v29 = vpop.permute.xlu0 %544  ;;  %v534_v31 = vmul.f32 %v527_v62, %v517_v27  ;;  %v535_v34 = vmul.f32 %v531_v63, %v518_v10 }
 0x26f   :  { %v540_v30 = vadd.f32 %v536_v25, %v495_v2  ;;  %v541_v9 = vadd.f32 %v537_v26, %v496_v3  ;;  %v538_v45 = vadd.f32 %v534_v31, %v493_v19  ;;  %v539_v43 = vadd.f32 %v535_v34, %v494_v20  ;;  %v657_v19 = vld [vmem:[#allocation2 + $0x10] sm:$0x3] }
 0x270   :  { %v662_v23 = vrot.slane %v657_v19, %v890_v11  ;;  %v666_v24 = vrot.slane %v657_v19, %v892_v13 }
 0x271   :  { %v547_v36 = vpop.permute.xlu1 %546  ;;  %v549_v41 = vpop.permute.xlu0 %548 }
 0x272   :  { %v551_v37 = vsel %vm550_vm5, %v543_v28, %v547_v36  ;;  %v553_v40 = vsel %vm550_vm5, %v547_v36, %v543_v28  ;;  %v552_v32 = vsel %vm550_vm5, %v545_v29, %v549_v41  ;;  %v554_v33 = vsel %vm550_vm5, %v549_v41, %v545_v29 }
 0x273   :  { %v562_v42 = vmul.f32 %v953_v15, %v551_v37  ;;  %v563_v14 = vmul.f32 %v953_v15, %v553_v40  ;;  %v564_v38 = vmul.f32 %v953_v15, %v552_v32  ;;  %v565_v39 = vmul.f32 %v953_v15, %v554_v33 }
 0x274   :  { %v621_v15 = vrot.slane %v612_v53, %v892_v13 }
 0x275   :  { %v579_v44 = vmul.f32 %v572_v0, %v562_v42  ;;  %v580_v46 = vmul.f32 %v576_v35, %v563_v14  ;;  %v588_v47 = vpop.permute.xlu1 %587  ;;  %v581_v48 = vmul.f32 %v572_v0, %v564_v38  ;;  %v582_v49 = vmul.f32 %v576_v35, %v565_v39  ;;  %v590_v50 = vpop.permute.xlu0 %589 }
 0x277   :  { %v583_v51 = vadd.f32 %v579_v44, %v538_v45  ;;  %v584_v52 = vadd.f32 %v580_v46, %v539_v43  ;;  %v585_v54 = vadd.f32 %v581_v48, %v540_v30  ;;  %v586_v55 = vadd.f32 %v582_v49, %v541_v9 }
 0x279   :  { %v592_v56 = vpop.permute.xlu1 %591  ;;  %v594_v60 = vpop.permute.xlu0 %593 }
 0x27a   :  { %v596_v58 = vsel %vm595_vm6, %v588_v47, %v592_v56  ;;  %v598_v59 = vsel %vm595_vm6, %v592_v56, %v588_v47  ;;  %v597_v12 = vsel %vm595_vm6, %v590_v50, %v594_v60  ;;  %v599_v6 = vsel %vm595_vm6, %v594_v60, %v590_v50 }
 0x27b   :  { %v609_v61 = vmul.f32 %v955_v16, %v597_v12  ;;  %v610_v62 = vmul.f32 %v955_v16, %v599_v6  ;;  %v607_v63 = vmul.f32 %v955_v16, %v596_v58  ;;  %v608_v1 = vmul.f32 %v955_v16, %v598_v59 }
 0x27d   :  { %v633_v2 = vpop.permute.xlu1 %632  ;;  %v626_v3 = vmul.f32 %v617_v57, %v609_v61  ;;  %v627_v7 = vmul.f32 %v621_v15, %v610_v62  ;;  %v635_v18 = vpop.permute.xlu0 %634  ;;  %v624_v5 = vmul.f32 %v617_v57, %v607_v63  ;;  %v625_v21 = vmul.f32 %v621_v15, %v608_v1  ;;  %v770_v57 = vld [vmem:[%s1075_s1 + $0x18] sm:$0xff] }
 0x27f   :  { %v630_v20 = vadd.f32 %v626_v3, %v585_v54  ;;  %v631_v4 = vadd.f32 %v627_v7, %v586_v55  ;;  %v628_v9 = vadd.f32 %v624_v5, %v583_v51  ;;  %v629_v31 = vadd.f32 %v625_v21, %v584_v52  ;;  %v769_v54 = vld [vmem:[%s1075_s1 + $0x10] sm:$0xff] }
 0x281   :  { %v637_v25 = vpop.permute.xlu1 %636  ;;  %v639_v10 = vpop.permute.xlu0 %638 }
 0x282   :  { %v641_v26 = vsel %vm640_vm7, %v633_v2, %v637_v25  ;;  %v643_v27 = vsel %vm640_vm7, %v637_v25, %v633_v2  ;;  %v642_v29 = vsel %vm640_vm7, %v635_v18, %v639_v10  ;;  %v644_v8 = vsel %vm640_vm7, %v639_v10, %v635_v18 }
 0x283   :  { %v652_v16 = vmul.f32 %v957_v17, %v641_v26  ;;  %v653_v28 = vmul.f32 %v957_v17, %v643_v27  ;;  %v654_v22 = vmul.f32 %v957_v17, %v642_v29  ;;  %v655_v30 = vmul.f32 %v957_v17, %v644_v8 }
 0x285   :  { %v669_v34 = vmul.f32 %v662_v23, %v652_v16  ;;  %v670_v11 = vmul.f32 %v666_v24, %v653_v28  ;;  %v671_v0 = vmul.f32 %v662_v23, %v654_v22  ;;  %v672_v13 = vmul.f32 %v666_v24, %v655_v30 }
 0x287   :  { %v673_v35 = vadd.f32 %v669_v34, %v628_v9  ;;  %v674_v36 = vadd.f32 %v670_v11, %v629_v31  ;;  %v675_v37 = vadd.f32 %v671_v0, %v630_v20  ;;  %v676_v40 = vadd.f32 %v672_v13, %v631_v4 }
 0x289   :  { %v677_v41 = vadd.f32 %v674_v36, %v673_v35  ;;  %v683_v42 = vmul.f32 %v673_v35, %v673_v35  ;;  %v680_v14 = vadd.f32 %v676_v40, %v675_v37  ;;  %v685_v32 = vmul.f32 %v675_v37, %v675_v37 }
 0x28a   :  { %v686_v33 = vmul.f32 %v676_v40, %v676_v40  ;;  %v684_v38 = vmul.f32 %v674_v36, %v674_v36 }
 0x28b   :  { %678 = vadd.xlane.f32.xlu1 %v677_v41  ;;  %681 = vadd.xlane.f32.xlu0 %v680_v14 }
 0x28c   :  { %v690_v39 = vadd.f32 %v686_v33, %v685_v32  ;;  %v687_v17 = vadd.f32 %v684_v38, %v683_v42 }
 0x28f   :  { %691 = vadd.xlane.f32.xlu1 %v690_v39  ;;  %688 = vadd.xlane.f32.xlu0 %v687_v17 }
 0x318   :  { %v679_v45 = vpop.xlane.xlu1 %678  ;;  %v682_v43 = vpop.xlane.xlu0 %681 }
 0x319   :  { %v693_v44 = vadd.f32 %v682_v43, %v679_v45 }
 0x31b   :  { %v695_v46 = vmul.f32 0.001953125, %v693_v44 }
 0x31c   :  { %v692_v47 = vpop.xlane.xlu1 %691  ;;  %v689_v48 = vpop.xlane.xlu0 %688 }
 0x31d   :  { %v694_v49 = vadd.f32 %v692_v47, %v689_v48  ;;  %v697_v50 = vmul.f32 %v695_v46, %v695_v46 }
 0x31f   :  { %v696_v51 = vmul.f32 0.001953125, %v694_v49 }
 0x321   :  { %v698_v52 = vsub.f32 %v696_v51, %v697_v50 }
 0x323   :  { %v699_v53 = vadd.f32 0.001, %v698_v52 }
 0x325   :  { %789 = vrsqrt.f32 %v699_v53 }
 0x32f   :  { %v790_v55 = vpop.eup %789 }
 0x330   :  { %v703_v56 = vmul.f32 %v790_v55, %v769_v54 }
 0x332   :  { %706 = vperm.xlu0 %783, %v703_v56   ;;  %v715_v15 = vmul.f32 %v703_v56, %v695_v46 }
 0x334   :  { %v716_v58 = vsub.f32 %v770_v57, %v715_v15 }
 0x336   :  { %719 = vperm.xlu1 %784, %v716_v58  }
 0x3b1   :  { %v707_v59 = vpop.permute.xlu0 %706 }
 0x3b2   :  { %v709_v60 = vmul.f32 %v707_v59, %v673_v35  ;;  %v710_v12 = vmul.f32 %v707_v59, %v674_v36  ;;  %v711_v6 = vmul.f32 %v707_v59, %v675_v37  ;;  %v712_v61 = vmul.f32 %v707_v59, %v676_v40 }
 0x3b5   :  { %v720_v62 = vpop.permute.xlu1 %719 }
 0x3b6   :  { %v722_v63 = vadd.f32 %v720_v62, %v709_v60  ;;  %v723_v1 = vadd.f32 %v720_v62, %v710_v12  ;;  %v724_v2 = vadd.f32 %v720_v62, %v711_v6  ;;  %v725_v3 = vadd.f32 %v720_v62, %v712_v61 }
 0x3b8   :  { %v726_v7 = vmax.f32 %v722_v63, 0.0  ;;  %v727_v18 = vmax.f32 %v723_v1, 0.0  ;;  %v728_v19 = vmax.f32 %v724_v2, 0.0  ;;  %v729_v20 = vmax.f32 %v725_v3, 0.0 }
 0x3ba   :  { %v734_v4 = vrot.slane %v726_v7, 4  ;;  %v735_v5 = vrot.slane %v727_v18, 4  ;;  %v736_v21 = vrot.slane %v728_v19, 4  ;;  %v737_v23 = vrot.slane %v729_v20, 4 }
 0x3bc   :  { %742 = vst [vmem:[%s1077_s3 + $0x10] ss:$-12 sps:$4 sm:$0xff] %v734_v4   ;;  %743 = vst [vmem:[%s1077_s3 + $0x18] ss:$-12 sps:$4 sm:$0xff] %v735_v5  }
 0x3bd   :  { %746 = vst [vmem:[%s1077_s3 + $0x30] ss:$-12 sps:$4 sm:$0xff] %v736_v21   ;;  %747 = vst [vmem:[%s1077_s3 + $0x38] ss:$-12 sps:$4 sm:$0xff] %v737_v23  }
 0x3be   :  { %754 = vsyncpa [#allocation3], 1 }

</bundles_post_ra>
